<compile_context>
chip_gen: v6e
topology: v6e:2x2x1
jax: 0.10.0
libtpu: 0.0.40
codegen_flags: <defaults>
</compile_context>

<pallas_src>
import functools

import jax
import jax.numpy as jnp
from jax.experimental import pallas as pl
from jax.experimental.pallas import tpu as pltpu


def _round_up(x: int, m: int) -> int:
    return (x + m - 1) // m * m


def _simam_kernel(x_ref, o_ref, *, inv_hw, inv_n, e_lambda):
    # x_ref / o_ref: (TILE_BC, HW) in VMEM.  Each row is one (b, c) pair.
    x = x_ref[...].astype(jnp.float32)

    # Fused single-pass statistics: two independent lane reductions.
    sum_x = jnp.sum(x, axis=-1, keepdims=True)          # (tile, 1)
    sum_x2 = jnp.sum(x * x, axis=-1, keepdims=True)     # (tile, 1)
    mu = sum_x * inv_hw
    s = sum_x2 - (sum_x * sum_x) * inv_hw               # == sum((x - mu)^2)

    # One approximate reciprocal per row (EUP slot, effectively free), with the
    # sigmoid-identity 0.5 folded in so the per-element chain is just
    # sub, mul, mul, add, tanh, mul/add, mul.
    inv_den = pl.reciprocal(4.0 * (s * inv_n + e_lambda), approx=True)
    half_inv_den = 0.5 * inv_den                         # (tile, 1)

    d = x - mu
    t = (d * d) * half_inv_den + 0.25                    # == 0.5 * y
    attn = 0.5 * jnp.tanh(t) + 0.5                       # == sigmoid(y)

    o_ref[...] = (x * attn).astype(o_ref.dtype)


def _vmem_capacity_bytes() -> int:
    try:
        cap = int(pltpu.get_tpu_info().vmem_capacity_bytes)
        if cap > 0:
            return cap
    except Exception:
        pass
    return 64 * 1024 * 1024  # conservative: v7x per-TensorCore VMEM


def simam(x, e_lambda: float = 1e-4):
    """SimAM forward: x * sigmoid(y), x is NCHW."""
    b, c, h, w = x.shape
    hw = h * w
    bc = b * c
    n = hw - 1
    inv_n = (1.0 / n) if n > 0 else float("inf")  # matches torch's div-by-zero

    x2d = x.reshape(bc, hw)  # contiguous reshape: no data movement
    itemsize = jnp.dtype(x.dtype).itemsize
    hw_vmem = _round_up(hw, 128)  # actual lane footprint of one row in VMEM

    # Row tile: as many 8-aligned rows as fit a ~1-4 MiB block, budgeted against
    # this generation's VMEM (double-buffered in + out = 4x block bytes).
    vmem_cap = _vmem_capacity_bytes()
    block_bytes = max(1 << 20, min(4 << 20, vmem_cap // 16))
    rows_budget = max(8, (block_bytes // (hw_vmem * itemsize)) // 8 * 8)
    tile_bc = min(rows_budget, _round_up(bc, 8))
    grid = (pl.cdiv(bc, tile_bc),)  # ragged last block: OOB stores are masked

    kernel = functools.partial(
        _simam_kernel,
        inv_hw=1.0 / float(hw),
        inv_n=float(inv_n),
        e_lambda=float(e_lambda),
    )

    per_block = tile_bc * hw_vmem * itemsize
    vmem_limit = int(min(int(vmem_cap * 0.9), max(32 << 20, 8 * per_block)))

    out2d = pl.pallas_call(
        kernel,
        out_shape=jax.ShapeDtypeStruct((bc, hw), x.dtype),
        grid_spec=pltpu.PrefetchScalarGridSpec(
            num_scalar_prefetch=0,
            grid=grid,
            in_specs=[pl.BlockSpec((tile_bc, hw), lambda i: (i, 0))],
            out_specs=pl.BlockSpec((tile_bc, hw), lambda i: (i, 0)),
        ),
        compiler_params=pltpu.CompilerParams(
            dimension_semantics=("parallel",),
            vmem_limit_bytes=vmem_limit,
        ),
    )(x2d)

    return out2d.reshape(b, c, h, w)


def simam_reference(x, e_lambda: float = 1e-4):
    """Pure-JAX reference matching the PyTorch forward."""
    b, c, h, w = x.shape
    n = w * h - 1
    x_minus_mu_square = (x - x.mean(axis=(2, 3), keepdims=True)) ** 2
    y = x_minus_mu_square / (
        4.0 * (x_minus_mu_square.sum(axis=(2, 3), keepdims=True) / n + e_lambda)
    ) + 0.5
    return x * jax.nn.sigmoid(y)


if __name__ == "__main__":
    key = jax.random.PRNGKey(0)
    x = jax.random.normal(key, (2, 4, 16, 16), dtype=jnp.float32)

    out = jax.block_until_ready(simam(x))

    ref = simam_reference(x)
    assert out.shape == ref.shape and out.dtype == ref.dtype
    # Tolerance covers the approximate per-row reciprocal and the fused
    # sum(x^2) - sum(x)^2/hw variance form.
    assert jnp.allclose(out, ref, atol=2e-3, rtol=2e-3), "mismatch vs reference"

    print("KERNEL_OK")
</pallas_src>

<mosaic_0001>
module attributes {stable_mosaic.version = 11 : i64} {
  func.func @_simam_kernel(%arg0: i32, %arg1: memref<8x256xf32, #tpu.memory_space<vmem>>, %arg2: memref<8x256xf32, #tpu.memory_space<vmem>>) attributes {dimension_semantics = [#tpu.dimension_semantics<parallel>], iteration_bounds = array<i64: 1>, scalar_prefetch = 0 : i64, scratch_operands = 0 : i64, tpu.core_type = #tpu.core_type<tc>, window_params = [{transform_indices = @transform_0, window_bounds = array<i64: 8, 256>}, {transform_indices = @transform_1, window_bounds = array<i64: 8, 256>}]} {
    %c0 = arith.constant 0 : index
    %c0_0 = arith.constant 0 : index
    %0 = vector.load %arg1[%c0, %c0_0] : memref<8x256xf32, #tpu.memory_space<vmem>>, vector<8x256xf32>
    %cst = arith.constant dense<0.000000e+00> : vector<8xf32>
    %1 = vector.multi_reduction <add>, %0, %cst [1] : vector<8x256xf32> to vector<8xf32>
    %2 = vector.shape_cast %1 : vector<8xf32> to vector<8x1xf32>
    %3 = arith.mulf %0, %0 : vector<8x256xf32>
    %cst_1 = arith.constant dense<0.000000e+00> : vector<8xf32>
    %4 = vector.multi_reduction <add>, %3, %cst_1 [1] : vector<8x256xf32> to vector<8xf32>
    %5 = vector.shape_cast %4 : vector<8xf32> to vector<8x1xf32>
    %cst_2 = arith.constant 3.906250e-03 : f32
    %6 = vector.broadcast %cst_2 : f32 to vector<8x1xf32>
    %7 = arith.mulf %2, %6 : vector<8x1xf32>
    %8 = arith.mulf %2, %2 : vector<8x1xf32>
    %cst_3 = arith.constant 3.906250e-03 : f32
    %9 = vector.broadcast %cst_3 : f32 to vector<8x1xf32>
    %10 = arith.mulf %8, %9 : vector<8x1xf32>
    %11 = arith.subf %5, %10 : vector<8x1xf32>
    %cst_4 = arith.constant 0.00392156886 : f32
    %12 = vector.broadcast %cst_4 : f32 to vector<8x1xf32>
    %13 = arith.mulf %11, %12 : vector<8x1xf32>
    %cst_5 = arith.constant 9.99999974E-5 : f32
    %14 = vector.broadcast %cst_5 : f32 to vector<8x1xf32>
    %15 = arith.addf %13, %14 : vector<8x1xf32>
    %cst_6 = arith.constant 4.000000e+00 : f32
    %16 = vector.broadcast %cst_6 : f32 to vector<8x1xf32>
    %17 = arith.mulf %16, %15 : vector<8x1xf32>
    %18 = tpu.reciprocal %17 {approx = true} : vector<8x1xf32> -> vector<8x1xf32>
    %cst_7 = arith.constant 5.000000e-01 : f32
    %19 = vector.broadcast %cst_7 : f32 to vector<8x1xf32>
    %20 = arith.mulf %19, %18 : vector<8x1xf32>
    %21 = vector.broadcast %7 : vector<8x1xf32> to vector<8x256xf32>
    %22 = arith.subf %0, %21 : vector<8x256xf32>
    %23 = arith.mulf %22, %22 : vector<8x256xf32>
    %24 = vector.broadcast %20 : vector<8x1xf32> to vector<8x256xf32>
    %25 = arith.mulf %23, %24 : vector<8x256xf32>
    %cst_8 = arith.constant 2.500000e-01 : f32
    %26 = vector.broadcast %cst_8 : f32 to vector<8x256xf32>
    %27 = arith.addf %25, %26 : vector<8x256xf32>
    %28 = math.tanh %27 : vector<8x256xf32>
    %cst_9 = arith.constant 5.000000e-01 : f32
    %29 = vector.broadcast %cst_9 : f32 to vector<8x256xf32>
    %30 = arith.mulf %29, %28 : vector<8x256xf32>
    %cst_10 = arith.constant 5.000000e-01 : f32
    %31 = vector.broadcast %cst_10 : f32 to vector<8x256xf32>
    %32 = arith.addf %30, %31 : vector<8x256xf32>
    %33 = arith.mulf %0, %32 : vector<8x256xf32>
    %c0_11 = arith.constant 0 : index
    %c0_12 = arith.constant 0 : index
    %34 = vector.load %arg2[%c0_11, %c0_12] : memref<8x256xf32, #tpu.memory_space<vmem>>, vector<8x256xf32>
    tpu.vector_store %arg2[%c0_11, %c0_12], %33 {strides = array<i32>} : memref<8x256xf32, #tpu.memory_space<vmem>>, vector<8x256xf32>,
    return
  }
  func.func @transform_0(%arg0: i32) -> (i32, i32) {
    %c0_i32 = arith.constant 0 : i32
    %c0_i32_0 = arith.constant 0 : i32
    return %arg0, %c0_i32 : i32, i32
  }
  func.func @transform_1(%arg0: i32) -> (i32, i32) {
    %c0_i32 = arith.constant 0 : i32
    %c0_i32_0 = arith.constant 0 : i32
    return %arg0, %c0_i32 : i32, i32
  }
}

</mosaic_0001>

<bundles_post_ra>
// kernel: tpu_custom_call.1
= control target key start
LH: loop header
LB: loop body
LE: loop exit
PB: predicated region body
PF: predicated region fallthrough
CT: control target
= control target key end

     0   :  { %6 = vsyncpa [#allocation3], 0  ;;  %s143_s0 = inlined_call_operand.hbm [shape: f32[8,256], index: 0, kind: input, shape index: {}]   ;;  %s144_s1 = inlined_call_operand.hbm [shape: f32[8,256], index: 1, kind: output, shape index: {}]  }
   0x1   :  { %7 = vsyncpa [#allocation4], 0  ;;  %s125_s6 = smov [#allocation2]  }
   0x2   :  { %s14_s7 = sshll.u32 %s125_s6, 4  ;;  %s15_s7 = int_to_ptr.vmem [resolvable:$true] %s14_s7 }
   0x3   :  { %s89_s8 = scalar_lea.vmem %s15_s7, 256  ;;  %p94_p1 = scmp.lt.s32.totalorder %s15_s7, %s15_s7 }
   0x4   :  { %p90_p0 = scmp.ne.s32.totalorder %s15_s7, %s89_s8  ;;  %p95_p2 = scmp.lt.s32.totalorder %s89_s8, %s89_s8 }
   0x6   :  { %p96_p3 = por %p95_p2, %p94_p1 }
   0x8   :  { %p97_p4 = pnand %p96_p3, %p90_p0 }
   0xa   :  { %100 = shalt.err (!%p97_p4)
}
   0xb   :  { %17 = dma.hbm_to_vmem [thread:$0]  %s143_s0, 256, %s15_s7, [#allocation3]  }
   0xc   :  { %121 = dma.done.wait [#allocation3], 256  }
   0xd   :  { %122 = vsyncadd [#allocation3], 4294967040  ;;  %v21_v0 = vld [vmem:[#allocation2] sm:$0xff]  ;;  %v22_v1 = vld [vmem:[#allocation2 + $0x8] sm:$0xff]  ;;  %s126_s0 = smov [#allocation5]  }
   0xe   :  { %v23_v2 = vadd.f32 %v22_v1, %v21_v0  ;;  %v26_v3 = vmul.f32 %v21_v0, %v21_v0  ;;  %v27_v4 = vmul.f32 %v22_v1, %v22_v1  ;;  %s64_s11 = sshll.u32 %s126_s0, 4  ;;  %s65_s11 = int_to_ptr.vmem [resolvable:$true] %s64_s11 }
   0xf   :  { %s101_s12 = scalar_lea.vmem %s65_s11, 256  ;;  %p106_p6 = scmp.lt.s32.totalorder %s65_s11, %s65_s11 }
  0x10   :  { %24 = vadd.xlane.f32.xlu0 %v23_v2  ;;  %v28_v5 = vadd.f32 %v27_v4, %v26_v3  ;;  %p102_p5 = scmp.ne.s32.totalorder %s65_s11, %s101_s12  ;;  %p107_p7 = scmp.lt.s32.totalorder %s101_s12, %s101_s12 }
  0x12   :  { %p108_p8 = por %p107_p7, %p106_p6 }
  0x14   :  { %29 = vadd.xlane.f32.xlu0 %v28_v5  ;;  %p109_p9 = pnand %p108_p8, %p102_p5 }
  0x99   :  { %v25_v6 = vpop.xlane.xlu0 %24 }
  0x9a   :  { %v32_v7 = vmul.f32 %v25_v6, %v25_v6  ;;  %v31_v14 = vmul.f32 0.00390625, %v25_v6 }
  0x9c   :  { %v33_v8 = vmul.f32 0.00390625, %v32_v7  ;;  %v40_v15 = vsub.f32 %v21_v0, %v31_v14  ;;  %v41_v16 = vsub.f32 %v22_v1, %v31_v14 }
  0x9d   :  { %v30_v9 = vpop.xlane.xlu0 %29 }
  0x9e   :  { %v34_v10 = vsub.f32 %v30_v9, %v33_v8  ;;  %v42_v18 = vmul.f32 %v40_v15, %v40_v15  ;;  %v43_v19 = vmul.f32 %v41_v16, %v41_v16 }
  0xa0   :  { %v35_v11 = vmul.f32 0.003921569, %v34_v10 }
  0xa2   :  { %v36_v12 = vadd.f32 0.0001, %v35_v11 }
  0xa4   :  { %v37_v13 = vmul.f32 4.0, %v36_v12 }
  0xa6   :  { %75 = vrcp.f32 %v37_v13 }
  0xb3   :  { %v76_v17 = vpop.eup %75 }
  0xb4   :  { %v39_v20 = vmul.f32 0.5, %v76_v17 }
  0xb6   :  { %v44_v21 = vmul.f32 %v42_v18, %v39_v20  ;;  %v45_v22 = vmul.f32 %v43_v19, %v39_v20 }
  0xb8   :  { %v46_v23 = vadd.f32 0.25, %v44_v21  ;;  %v47_v24 = vadd.f32 0.25, %v45_v22 }
  0xba   :  { %77 = vtanh.f32 %v46_v23 }
  0xbb   :  { %79 = vtanh.f32 %v47_v24 }
  0xc7   :  { %v78_v25 = vpop.eup %77 }
  0xc8   :  { %v80_v26 = vpop.eup %79  ;;  %v50_v27 = vmul.f32 0.5, %v78_v25 }
  0xc9   :  { %v51_v28 = vmul.f32 0.5, %v80_v26 }
  0xca   :  { %v52_v29 = vadd.f32 0.5, %v50_v27 }
  0xcb   :  { %v53_v30 = vadd.f32 0.5, %v51_v28 }
  0xcc   :  { %v54_v31 = vmul.f32 %v52_v29, %v21_v0 }
  0xcd   :  { %v55_v32 = vmul.f32 %v53_v30, %v22_v1 }
  0xce   :  { %56 = vst [vmem:[#allocation5] sm:$0xff] %v54_v31 }
  0xcf   :  { %57 = vst [vmem:[#allocation5 + $0x8] sm:$0xff] %v55_v32 }
  0xd0   :  { %112 = shalt.err (!%p109_p9)
}
  0xd1   :  { %67 = dma.vmem_to_hbm [thread:$0]  %s65_s11, 256, %s144_s1, [#allocation4]  }
  0xd2   :  { %123 = dma.done.wait [#allocation4], 256  }
  0xd3   :  { %124 = vsyncadd [#allocation4], 4294967040 }
  0xd4   :  { %71 = vsyncpa [#allocation3], 1 }
  0xd5   :  { %72 = vsyncpa [#allocation4], 1 }

</bundles_post_ra>
